<compile_context>
chip_gen: v7x
topology: tpu7x:2x2x1
jax: 0.10.0
libtpu: 0.0.40
codegen_flags: <defaults>
</compile_context>

<pallas_src>
import functools

import jax
import jax.numpy as jnp
from jax.experimental import pallas as pl
from jax.experimental.pallas import tpu as pltpu


def _round_up(n, m):
    return ((n + m - 1) // m) * m


# ---------------------------------------------------------------------------
# Kernel: one grid step == one block of TS timesteps.
# ---------------------------------------------------------------------------
def rnn_block_kernel(x_ref, wu_ref, wv_ref, bias_ref, h0_ref, out_ref,
                     h_scr, dma_sem, *, ts, batch):
    blk = pl.program_id(0)

    @pl.when(blk == 0)
    def _():
        # h0 is read exactly once -> keep it in HBM (pl.ANY) and DMA it into
        # the f32 hidden scratch instead of holding a resident VMEM block.
        cp = pltpu.make_async_copy(h0_ref, h_scr, dma_sem)
        cp.start()
        cp.wait()

    # Hoisted, non-recurrent input projection: one MXU matmul over all
    # ts*batch rows of this time block (bf16 operands, f32 accumulate); bias
    # added on the VPU (no ones-column trick, no K inflation).
    proj = jnp.dot(x_ref[...], wu_ref[...],
                   preferred_element_type=jnp.float32) + bias_ref[...]

    # Serial recurrence: only h_{t-1} @ V^T is left on the per-step critical
    # path.  ts is a small static constant -> full static unroll (static row
    # slices of proj, static leading-dim stores into out_ref).
    h = h_scr[...]                                    # f32 carried hidden
    for s in range(ts):
        z = proj[s * batch:(s + 1) * batch, :] + jnp.dot(
            h.astype(wv_ref.dtype), wv_ref[...],
            preferred_element_type=jnp.float32)
        h = jnp.tanh(z)                               # f32 add + tanh (VPU/EUP)
        out_ref[s] = h.astype(out_ref.dtype)
    h_scr[...] = h                                    # carry to next time block


# ---------------------------------------------------------------------------
# One-time parameter packing (outside any hot loop)
# ---------------------------------------------------------------------------
def prepare_rnn_cell_params(u_weight, u_bias, v_weight, *,
                            param_dtype=jnp.bfloat16):
    """Pack U.weight (H, I), U.bias (H,), V.weight (H, H) once into lane-padded
    matmul operands:
        wu   (I, H_pad)      = U^T  (zero-padded columns beyond H)
        wv   (H_pad, H_pad)  = V^T  (zero-padded)
        bias (1, H_pad)      f32, added on the VPU after the dot
    param_dtype=bf16 -> MXU-native operands + half the resident VMEM; pass
    jnp.float32 for exact f32 parity with the PyTorch module."""
    H, I = u_weight.shape
    h_pad = _round_up(max(H, 1), 128)
    wu = jnp.zeros((I, h_pad), param_dtype).at[:, :H].set(
        u_weight.T.astype(param_dtype))
    wv = jnp.zeros((h_pad, h_pad), param_dtype).at[:H, :H].set(
        v_weight.T.astype(param_dtype))
    bias = jnp.zeros((1, h_pad), jnp.float32).at[0, :H].set(
        u_bias.astype(jnp.float32))
    return wu, wv, bias


# ---------------------------------------------------------------------------
# Sequence rollout: one pallas_call, TS timesteps per grid step
# ---------------------------------------------------------------------------
def rnn_rollout(x_seq, hidden, params, hid_size, *, ts=8):
    """x_seq: (T, B, I); hidden: (B, H) or None; returns (T, B, H)."""
    wu, wv, bias = params
    T, B, I = x_seq.shape
    h_pad = wu.shape[1]
    assert T % ts == 0, "sequence length must be a multiple of the time block"
    nb = T // ts
    assert (ts * B) % 8 == 0 or nb == 1, "time-block rows must be sublane-aligned"

    # Free row-major collapse; no padded copy of x is materialized in HBM.
    x2 = x_seq.reshape(T * B, I).astype(wu.dtype)

    h0 = jnp.zeros((B, h_pad), jnp.float32)
    if hidden is not None:
        h0 = h0.at[:, :hid_size].set(hidden.astype(jnp.float32))

    out = pl.pallas_call(
        functools.partial(rnn_block_kernel, ts=ts, batch=B),
        out_shape=jax.ShapeDtypeStruct((T, B, h_pad), jnp.float32),
        grid=(nb,),
        in_specs=[
            # Per-block x rows, streamed unpadded (only real bytes are DMA'd).
            pl.BlockSpec((ts * B, I), lambda b: (b, 0)),
            # Packed weights: constant block index -> stay resident in VMEM.
            pl.BlockSpec(wu.shape, lambda b: (0, 0)),
            pl.BlockSpec(wv.shape, lambda b: (0, 0)),
            pl.BlockSpec(bias.shape, lambda b: (0, 0)),
            # Initial hidden: raw HBM ref, DMA'd once at block 0.
            pl.BlockSpec(memory_space=pl.ANY),
        ],
        out_specs=pl.BlockSpec((ts, B, h_pad), lambda b: (b, 0, 0)),
        scratch_shapes=[
            pltpu.VMEM((B, h_pad), jnp.float32),      # f32 recurrent hidden
            pltpu.SemaphoreType.DMA(()),              # h0 load semaphore
        ],
        compiler_params=pltpu.CompilerParams(
            # The time axis is a serial recurrence (hidden carried in scratch).
            dimension_semantics=("arbitrary",)),
    )(x2, wu, wv, bias, h0)
    return out[:, :, :hid_size]


def rnn_cell_forward(x, hidden, params, hid_size):
    """Single-step RNNCell.forward(x, hidden): the T = 1, TS = 1 rollout."""
    return rnn_rollout(x[None], hidden, params, hid_size, ts=1)[0]


# ---------------------------------------------------------------------------
# Deterministic parameter construction (mirrors RNNCell.__init__)
# ---------------------------------------------------------------------------
def xavier_normal(key, shape):
    fan_out, fan_in = shape
    std = jnp.sqrt(2.0 / (fan_in + fan_out))
    return std * jax.random.normal(key, shape, dtype=jnp.float32)


def henaff_orthogonal(key, n):
    """henaff_init -> skew-symmetric angles; V = expm(triu(A,1) - triu(A,1).T)."""
    thetas = jax.random.uniform(key, (n // 2,), minval=-jnp.pi, maxval=jnp.pi,
                                dtype=jnp.float32)
    A = jnp.zeros((n, n), dtype=jnp.float32)
    idx = jnp.arange(n // 2)
    A = A.at[2 * idx, 2 * idx + 1].set(thetas)
    A_skew = jnp.triu(A, k=1) - jnp.triu(A, k=1).T       # _A()
    return jax.scipy.linalg.expm(A_skew)                 # _B(): orthogonal


if __name__ == "__main__":
    batch, inp_size, hid_size, seq_len, ts = 2, 16, 32, 16, 8

    key = jax.random.PRNGKey(0)
    k_x, k_uw, k_ub, k_v, k_h, k_xs = jax.random.split(key, 6)

    # Parameters (deterministic, synthetic)
    u_weight = xavier_normal(k_uw, (hid_size, inp_size))             # U.weight (H, I)
    bound = 1.0 / jnp.sqrt(jnp.float32(inp_size))
    u_bias = jax.random.uniform(k_ub, (hid_size,), minval=-bound,    # U.bias (H,)
                                maxval=bound, dtype=jnp.float32)
    v_weight = henaff_orthogonal(k_v, hid_size)                      # V.weight (H, H)

    params = prepare_rnn_cell_params(u_weight, u_bias, v_weight)     # packed once (bf16)

    # The kernel feeds the MXU bf16 operands (f32 accumulate / bias / tanh);
    # the references apply the identical bf16 rounding so tolerances stay tight.
    q = lambda a: a.astype(jnp.bfloat16).astype(jnp.float32)
    uT, vT = q(u_weight).T, q(v_weight).T

    # --- single step, hidden=None (module default: zeros) ---------------------
    x = jax.random.normal(k_x, (batch, inp_size), dtype=jnp.float32)
    h1 = jax.block_until_ready(rnn_cell_forward(x, None, params, hid_size))
    ref1 = jnp.tanh(q(x) @ uT + u_bias)
    assert jnp.allclose(h1, ref1, atol=2e-5, rtol=1e-5), "mismatch (zero hidden)"

    # --- single step, random nonzero hidden (validates the recurrent V path) --
    hidden = jax.random.normal(k_h, (batch, hid_size), dtype=jnp.float32)
    h2 = jax.block_until_ready(rnn_cell_forward(x, hidden, params, hid_size))
    ref2 = jnp.tanh(q(x) @ uT + u_bias + q(hidden) @ vT)
    assert jnp.allclose(h2, ref2, atol=2e-5, rtol=1e-5), "mismatch (random hidden)"

    # --- multi-step rollout: 2 time blocks -> hidden carried across grid steps
    x_seq = jax.random.normal(k_xs, (seq_len, batch, inp_size), dtype=jnp.float32)
    h_seq = jax.block_until_ready(rnn_rollout(x_seq, None, params, hid_size, ts=ts))

    def step(h_prev, x_t):
        h_t = jnp.tanh(q(x_t) @ uT + u_bias + q(h_prev) @ vT)
        return h_t, h_t

    _, ref_seq = jax.lax.scan(step, jnp.zeros((batch, hid_size), jnp.float32), x_seq)
    # Looser tolerance: f32 accumulation-order noise can flip the bf16 rounding
    # of the carried hidden by one ulp, which then propagates through V.
    assert jnp.allclose(h_seq, ref_seq, atol=5e-3, rtol=1e-3), "mismatch (rollout)"

    print("KERNEL_OK")
</pallas_src>

<mosaic_0001>
module attributes {stable_mosaic.version = 11 : i64} {
  func.func @rnn_block_kernel(%arg0: i32, %arg1: memref<2x16xbf16, #tpu.memory_space<vmem>>, %arg2: memref<16x128xbf16, #tpu.memory_space<vmem>>, %arg3: memref<128x128xbf16, #tpu.memory_space<vmem>>, %arg4: memref<1x128xf32, #tpu.memory_space<vmem>>, %arg5: memref<2x128xf32, #tpu.memory_space<any>>, %arg6: memref<1x2x128xf32, #tpu.memory_space<vmem>>, %arg7: memref<2x128xf32, #tpu.memory_space<vmem>>, %arg8: memref<!tpu.dma_semaphore, #tpu.memory_space<semaphore_mem>>) attributes {dimension_semantics = [#tpu.dimension_semantics<arbitrary>], iteration_bounds = array<i64: 1>, scalar_prefetch = 0 : i64, scratch_operands = 2 : i64, tpu.core_type = #tpu.core_type<tc>, window_params = [{transform_indices = @transform_0, window_bounds = array<i64: 2, 16>}, {pipeline_mode = #tpu.pipeline_mode<synchronous>, transform_indices = @transform_1, window_bounds = array<i64: 16, 128>}, {pipeline_mode = #tpu.pipeline_mode<synchronous>, transform_indices = @transform_2, window_bounds = array<i64: 128, 128>}, {pipeline_mode = #tpu.pipeline_mode<synchronous>, transform_indices = @transform_3, window_bounds = array<i64: 1, 128>}, {}, {transform_indices = @transform_5, window_bounds = array<i64: 1, 2, 128>}]} {
    %c0_i32 = arith.constant 0 : i32
    %0 = arith.cmpi eq, %arg0, %c0_i32 : i32
    %1 = arith.extui %0 : i1 to i32
    %c0_i32_0 = arith.constant 0 : i32
    %2 = arith.cmpi ne, %1, %c0_i32_0 : i32
    scf.if %2 {
      tpu.enqueue_dma source(%arg5 : memref<2x128xf32, #tpu.memory_space<any>>) target(%arg7 : memref<2x128xf32, #tpu.memory_space<vmem>>) target_semaphore(%arg8 : memref<!tpu.dma_semaphore, #tpu.memory_space<semaphore_mem>>)
      tpu.wait_dma2 semaphore(%arg8 : memref<!tpu.dma_semaphore, #tpu.memory_space<semaphore_mem>>) src(%arg5 : memref<2x128xf32, #tpu.memory_space<any>>) dst(%arg7 : memref<2x128xf32, #tpu.memory_space<vmem>>)
    } else {
    }
    %c0 = arith.constant 0 : index
    %c0_1 = arith.constant 0 : index
    %3 = vector.load %arg1[%c0, %c0_1] : memref<2x16xbf16, #tpu.memory_space<vmem>>, vector<2x16xbf16>
    %c0_2 = arith.constant 0 : index
    %c0_3 = arith.constant 0 : index
    %4 = vector.load %arg2[%c0_2, %c0_3] : memref<16x128xbf16, #tpu.memory_space<vmem>>, vector<16x128xbf16>
    %cst = arith.constant dense<0.000000e+00> : vector<2x128xf32>
    %5 = tpu.matmul %3, %4, %cst {dimension_numbers = #tpu.dot_dimension_numbers<[1], [0], [0], [1], [0, 0, 1, 1], [], []>} : vector<2x16xbf16>, vector<16x128xbf16>, vector<2x128xf32> -> vector<2x128xf32>
    %c0_4 = arith.constant 0 : index
    %c0_5 = arith.constant 0 : index
    %6 = vector.load %arg4[%c0_4, %c0_5] : memref<1x128xf32, #tpu.memory_space<vmem>>, vector<1x128xf32>
    %7 = vector.broadcast %6 : vector<1x128xf32> to vector<2x128xf32>
    %8 = arith.addf %5, %7 : vector<2x128xf32>
    %c0_6 = arith.constant 0 : index
    %c0_7 = arith.constant 0 : index
    %9 = vector.load %arg7[%c0_6, %c0_7] : memref<2x128xf32, #tpu.memory_space<vmem>>, vector<2x128xf32>
    %10 = arith.truncf %9 : vector<2x128xf32> to vector<2x128xbf16>
    %c0_8 = arith.constant 0 : index
    %c0_9 = arith.constant 0 : index
    %11 = vector.load %arg3[%c0_8, %c0_9] : memref<128x128xbf16, #tpu.memory_space<vmem>>, vector<128x128xbf16>
    %cst_10 = arith.constant dense<0.000000e+00> : vector<2x128xf32>
    %12 = tpu.matmul %10, %11, %cst_10 {dimension_numbers = #tpu.dot_dimension_numbers<[1], [0], [0], [1], [0, 0, 1, 1], [], []>} : vector<2x128xbf16>, vector<128x128xbf16>, vector<2x128xf32> -> vector<2x128xf32>
    %13 = arith.addf %8, %12 : vector<2x128xf32>
    %14 = math.tanh %13 : vector<2x128xf32>
    %c0_11 = arith.constant 0 : index
    %c0_12 = arith.constant 0 : index
    %c0_13 = arith.constant 0 : index
    %15 = vector.load %arg6[%c0_11, %c0_12, %c0_13] : memref<1x2x128xf32, #tpu.memory_space<vmem>>, vector<1x2x128xf32>
    %16 = vector.shape_cast %15 : vector<1x2x128xf32> to vector<2x128xf32>
    %17 = vector.shape_cast %14 : vector<2x128xf32> to vector<1x2x128xf32>
    tpu.vector_store %arg6[%c0_11, %c0_12, %c0_13], %17 {strides = array<i32>} : memref<1x2x128xf32, #tpu.memory_space<vmem>>, vector<1x2x128xf32>,
    %c0_14 = arith.constant 0 : index
    %c0_15 = arith.constant 0 : index
    %18 = vector.load %arg7[%c0_14, %c0_15] : memref<2x128xf32, #tpu.memory_space<vmem>>, vector<2x128xf32>
    tpu.vector_store %arg7[%c0_14, %c0_15], %14 {strides = array<i32>} : memref<2x128xf32, #tpu.memory_space<vmem>>, vector<2x128xf32>,
    return
  }
  func.func @transform_0(%arg0: i32) -> (i32, i32) {
    %c0_i32 = arith.constant 0 : i32
    %c0_i32_0 = arith.constant 0 : i32
    return %arg0, %c0_i32 : i32, i32
  }
  func.func @transform_1(%arg0: i32) -> (i32, i32) {
    %c0_i32 = arith.constant 0 : i32
    %c0_i32_0 = arith.constant 0 : i32
    %c0_i32_1 = arith.constant 0 : i32
    return %c0_i32, %c0_i32_0 : i32, i32
  }
  func.func @transform_2(%arg0: i32) -> (i32, i32) {
    %c0_i32 = arith.constant 0 : i32
    %c0_i32_0 = arith.constant 0 : i32
    %c0_i32_1 = arith.constant 0 : i32
    return %c0_i32, %c0_i32_0 : i32, i32
  }
  func.func @transform_3(%arg0: i32) -> (i32, i32) {
    %c0_i32 = arith.constant 0 : i32
    %c0_i32_0 = arith.constant 0 : i32
    %c0_i32_1 = arith.constant 0 : i32
    return %c0_i32, %c0_i32_0 : i32, i32
  }
  func.func @transform_5(%arg0: i32) -> (i32, i32, i32) {
    %c0_i32 = arith.constant 0 : i32
    %c0_i32_0 = arith.constant 0 : i32
    %c0_i32_1 = arith.constant 0 : i32
    return %arg0, %c0_i32, %c0_i32_0 : i32, i32, i32
  }
}

</mosaic_0001>

<bundles_post_ra>
// kernel: tpu_custom_call.1
= control target key start
LH: loop header
LB: loop body
LE: loop exit
PB: predicated region body
PF: predicated region fallthrough
CT: control target
= control target key end

     0   :  { %10 = vsyncpa [#allocation5], 0  ;;  %s576_s0 = inlined_call_operand.hbm [shape: bf16[2,16], index: 0, kind: input, shape index: {}]   ;;  %s577_s1 = inlined_call_operand.hbm [shape: bf16[16,128], index: 1, kind: input, shape index: {}]   ;;  %s578_s2 = inlined_call_operand.hbm [shape: bf16[128,128], index: 2, kind: input, shape index: {}]   ;;  %s579_s3 = inlined_call_operand.vmem [shape: f32[1,128], index: 3, kind: input, shape index: {}]   ;;  %s580_s4 = inlined_call_operand.vmem [shape: f32[2,128], index: 4, kind: input, shape index: {}]   ;;  %s581_s5 = inlined_call_operand.hbm [shape: f32[1,2,128], index: 5, kind: output, shape index: {}]  }
   0x1   :  { %11 = vsyncpa [#allocation8], 0 }
   0x2   :  { %12 = vsyncpa [#allocation6], 0  ;;  %s478_s18 = smov [#allocation7]   ;;  %s382_s22 = scalar_lea.hbm %s577_s1, 128 }
   0x3   :  { %s28_s19 = sshll.u32 %s478_s18, 4  ;;  %p383_p0 = scmp.ne.s32.totalorder %s577_s1, %s382_s22  ;;  %s29_s19 = int_to_ptr.vmem [resolvable:$true] %s28_s19 }
   0x4   :  { %p386_p1 = scmp.lt.u32.totalorder %s382_s22, %s577_s1 }
   0x6   :  { %p388_p2 = pnand %p386_p1, %p383_p0 }
   0x8   :  { %391 = shalt.err (!%p388_p2)
}
   0x9   :  { %s392_s27 = scalar_lea.vmem %s29_s19, 128  ;;  %p397_p4 = scmp.lt.s32.totalorder %s29_s19, %s29_s19 }
   0xa   :  { %p393_p3 = scmp.ne.s32.totalorder %s29_s19, %s392_s27  ;;  %p398_p5 = scmp.lt.s32.totalorder %s392_s27, %s392_s27 }
   0xc   :  { %p399_p6 = por %p398_p5, %p397_p4 }
   0xe   :  { %p400_p7 = pnand %p399_p6, %p393_p3 }
  0x10   :  { %403 = shalt.err (!%p400_p7)
}
  0x11   :  { %s479_s28 = smov 64   ;;  %s480_s29 = smov 4  }
  0x12   :  { %34 = dma.hbm_to_vmem [thread:$0]  %s577_s1, 128, %s29_s19, [#allocation8], %s479_s28, %s479_s28, %s480_s29  }
  0x13   :  { %s481_s7 = smov [#allocation4]   ;;  %s482_s9 = smov [#allocation9]  }
  0x14   :  { %s19_s8 = sshll.u32 %s481_s7, 4  ;;  %s40_s10 = sshll.u32 %s482_s9, 4  ;;  %s20_s8 = int_to_ptr.vmem [resolvable:$true] %s19_s8  ;;  %s41_s10 = int_to_ptr.vmem [resolvable:$true] %s40_s10 }
  0x15   :  { %s404_s13 = scalar_lea.hbm %s576_s0, 16 }
  0x16   :  { %p405_p8 = scmp.ne.s32.totalorder %s576_s0, %s404_s13  ;;  %p408_p9 = scmp.lt.u32.totalorder %s404_s13, %s576_s0 }
  0x18   :  { %p410_p10 = pnand %p408_p9, %p405_p8 }
  0x1a   :  { %413 = shalt.err (!%p410_p10)
}
  0x1b   :  { %s414_s1 = scalar_lea.vmem %s20_s8, 16  ;;  %s418_s18 = scalar_lea.vmem %s20_s8, 32 }
  0x1c   :  { %p415_p11 = scmp.ne.s32.totalorder %s20_s8, %s414_s1  ;;  %p419_p12 = scmp.lt.s32.totalorder %s20_s8, %s20_s8 }
  0x1d   :  { %p420_p13 = scmp.lt.s32.totalorder %s418_s18, %s414_s1 }
  0x1f   :  { %p421_p0 = por %p420_p13, %p419_p12 }
  0x21   :  { %p422_p1 = pnand %p421_p0, %p415_p11 }
  0x23   :  { %425 = shalt.err (!%p422_p1)
}
  0x24   :  { %22 = dma.hbm_to_vmem [thread:$0]  %s576_s0, 16, %s20_s8, [#allocation5]  }
  0x25   :  { %s426_s23 = scalar_lea.hbm %s578_s2, 1024 }
  0x26   :  { %p427_p2 = scmp.ne.s32.totalorder %s578_s2, %s426_s23  ;;  %p430_p3 = scmp.lt.u32.totalorder %s426_s23, %s578_s2 }
  0x28   :  { %p432_p4 = pnand %p430_p3, %p427_p2 }
  0x2a   :  { %435 = shalt.err (!%p432_p4)
}
  0x2b   :  { %s436_s30 = scalar_lea.vmem %s41_s10, 1024  ;;  %p441_p6 = scmp.lt.s32.totalorder %s41_s10, %s41_s10 }
  0x2c   :  { %p437_p5 = scmp.ne.s32.totalorder %s41_s10, %s436_s30  ;;  %p442_p7 = scmp.lt.s32.totalorder %s436_s30, %s436_s30 }
  0x2e   :  { %p443_p8 = por %p442_p7, %p441_p6 }
  0x30   :  { %p444_p9 = pnand %p443_p8, %p437_p5 }
  0x32   :  { %447 = shalt.err (!%p444_p9)
}
  0x33   :  { %46 = dma.hbm_to_vmem [thread:$0]  %s578_s2, 1024, %s41_s10, [#allocation8], %s479_s28, %s479_s28, %s480_s29  }
  0x34   :  { %470 = dma.done.wait [#allocation5], 16  }
  0x35   :  { %471 = vsyncadd [#allocation5], 4294967280 }
  0x36   :  { %472 = dma.done.wait [#allocation8], 1152  }
  0x37   :  { %473 = vsyncadd [#allocation8], 4294966144  ;;  %v80_v0 = vld [vmem:[%s580_s4] sm:$0x3] }
  0x38   :  { %81 = vst [vmem:[#allocation2] sm:$0x3] %v80_v0 }
  0x39   :  { %106 = vsyncadd [#allocation3], 32 }
  0x3a   :  { %474 = dma.done.wait [#allocation3], 32 }
  0x3b   :  { %475 = vsyncadd [#allocation3], 4294967264  ;;  %v483_v1 = vmov 0.0   ;;  %vm484_vm0 = vmmov 0   ;;  %v371_v2 = vld [vmem:[#allocation9] sm:$0xff]   ;;  %v372_v3 = vld [vmem:[#allocation9 + $0x8] sm:$0xff]  }
  0x3c   :  { %341 = vmatprep.subr.bf16.mxu0 %v483_v1  ;;  %335 = vmatprep.subr.bf16.mxu1 %v483_v1  ;;  %v373_v4 = vld [vmem:[#allocation9 + $0x10] sm:$0xff]   ;;  %v377_v5 = vld [vmem:[#allocation7] sm:$0xff]   ;;  %vm126_vm1 = vcmask 130048   ;;  %v375_v8 = vld [vmem:[#allocation9 + $0x20] sm:$0xff]   ;;  %s485_s28 = smov [#allocation10]  }
  0x3d   :  { %337 = vmatprep.mubr.msk.bf16.mxu1 %vm484_vm0, %v483_v1  ;;  %357 = vmatprep.mubr.msk.bf16.mxu0 %vm484_vm0, %v483_v1  ;;  %v110_v6 = vld [vmem:[#allocation4] sm:$0x1]  ;;  %v374_v7 = vld [vmem:[#allocation9 + $0x18] sm:$0xff]   ;;  %v376_v9 = vld [vmem:[#allocation9 + $0x28] sm:$0xff]   ;;  %s286_s29 = sshll.u32 %s485_s28, 4  ;;  %s287_s29 = int_to_ptr.vmem [resolvable:$true] %s286_s29 }
  0x3e   :  { %342 = vmatpush3.bf16.msra.mxu0 %v371_v2  ;;  %336 = vmatpush3.bf16.msra.mxu1 %v377_v5  ;;  %v378_v10 = vld [vmem:[#allocation9 + $0x30] sm:$0xff]   ;;  %v379_v11 = vld [vmem:[#allocation9 + $0x38] sm:$0xff]   ;;  %v312_v18 = vld [vmem:[%s579_s3] ss:$0 sm:$0xff]  ;;  %s448_s9 = scalar_lea.vmem %s287_s29, 32  ;;  %p453_p11 = scmp.lt.s32.totalorder %s287_s29, %s287_s29 }
  0x3f   :  { %343 = vmatprep.subr.bf16.mxu0 %v483_v1  ;;  %v170_v12 = vld [vmem:[#allocation2] sm:$0x3]  ;;  %p449_p10 = scmp.ne.s32.totalorder %s287_s29, %s448_s9  ;;  %p454_p12 = scmp.lt.s32.totalorder %s448_s9, %s448_s9 }
  0x40   :  { %v171_v13 = vpack.c.bf16 %v170_v12, %v170_v12 }
  0x41   :  { %338 = vmatmul.mubr.msk.bf16.vlgmr.msra.gmra.mrb[0].mxu1 %vm126_vm1, %v110_v6  ;;  %p455_p13 = por %p454_p12, %p453_p11 }
  0x42   :  { %344 = vmatpush3.bf16.msra.mxu0 %v372_v3 }
  0x43   :  { %345 = vmatprep.subr.bf16.mxu0 %v483_v1  ;;  %p456_p0 = pnand %p455_p13, %p449_p10 }
  0x46   :  { %346 = vmatpush3.bf16.msra.mxu0 %v373_v4 }
  0x47   :  { %347 = vmatprep.subr.bf16.mxu0 %v483_v1 }
  0x4a   :  { %348 = vmatpush3.bf16.msra.mxu0 %v374_v7 }
  0x4b   :  { %349 = vmatprep.subr.bf16.mxu0 %v483_v1 }
  0x4e   :  { %350 = vmatpush3.bf16.msra.mxu0 %v375_v8 }
  0x4f   :  { %351 = vmatprep.subr.bf16.mxu0 %v483_v1 }
  0x52   :  { %352 = vmatpush3.bf16.msra.mxu0 %v376_v9 }
  0x53   :  { %353 = vmatprep.subr.bf16.mxu0 %v483_v1 }
  0x56   :  { %354 = vmatpush3.bf16.msra.mxu0 %v378_v10 }
  0x57   :  { %355 = vmatprep.subr.bf16.mxu0 %v483_v1 }
  0x5a   :  { %356 = vmatpush3.bf16.msra.mxu0 %v379_v11 }
  0x5d   :  { %358 = vmatmul.mubr.bf16.vlgmr.msra.gmra.mrb[0].mxu0 %v171_v13 }
 0x114   :  { %v164_v14 = vpop.f32.mrb[0].mxu1 }
 0x115   :  { %v339_v15 = vpop.f32.mrb[1].mxu1  ;;  %v165_v19 = vadd.f32 %v312_v18, %v164_v14 }
 0x116   :  { %v167_v16 = vpop.f32.mrb[2].mxu1 }
 0x117   :  { %v340_v17 = vpop.f32.mrb[3].mxu1 }
 0x130   :  { %v270_v20 = vpop.f32.mrb[0].mxu0 }
 0x131   :  { %v276_v21 = vadd.f32 %v270_v20, %v165_v19  ;;  %v359_v22 = vpop.f32.mrb[1].mxu0 }
 0x132   :  { %v273_v23 = vpop.f32.mrb[2].mxu0 }
 0x133   :  { %380 = vtanh.f32 %v276_v21  ;;  %v360_v24 = vpop.f32.mrb[3].mxu0 }
 0x13d   :  { %v381_v25 = vpop.eup %380 }
 0x13e   :  { %279 = vst [vmem:[#allocation2] sm:$0x3] %v381_v25  ;;  %278 = vst [vmem:[#allocation10] sm:$0x3] %v381_v25 }
 0x13f   :  { %459 = shalt.err (!%p456_p0)
}
 0x140   :  { %s460_s11 = scalar_lea.hbm %s581_s5, 32 }
 0x141   :  { %p461_p1 = scmp.ne.s32.totalorder %s581_s5, %s460_s11  ;;  %p464_p2 = scmp.lt.u32.totalorder %s460_s11, %s581_s5 }
 0x143   :  { %p466_p3 = pnand %p464_p2, %p461_p1 }
 0x145   :  { %469 = shalt.err (!%p466_p3)
}
 0x146   :  { %289 = dma.vmem_to_hbm [thread:$0]  %s287_s29, 32, %s581_s5, [#allocation6]  }
 0x147   :  { %476 = dma.done.wait [#allocation6], 32  }
 0x148   :  { %477 = vsyncadd [#allocation6], 4294967264 }
 0x149   :  { %293 = vsyncpa [#allocation5], 1 }
 0x14a   :  { %294 = vsyncpa [#allocation8], 1 }
 0x14b   :  { %295 = vsyncpa [#allocation6], 1 }
 0x14c   :  { %296 = vsyncmov [#allocation3] }
 0x14f   :  { %s297_s1 = vpop.sfrf %296 }
 0x150   :  { %p323_p4 = scmp.ne.s32.totalorder %s297_s1, 0 }
 0x152   :  { %301 = shalt.err (%p323_p4)  }

</bundles_post_ra>
